<compile_context>
chip_gen: v7x
topology: tpu7x:2x2x1
jax: 0.10.0
libtpu: 0.0.40
codegen_flags: <defaults>
</compile_context>

<pallas_src>
import functools

import jax
import jax.numpy as jnp
from jax import lax
from jax.experimental import pallas as pl
from jax.experimental.pallas import tpu as pltpu

_LANE = 128          # TPU lane width; output channels are padded to this
_MAX_TILE_M = 1024   # VMEM-safe cap on rows per tile (re-derive if shapes grow; v7x VMEM is 64 MiB)


def _round_up(x, m):
    return (x + m - 1) // m * m


def _cdiv(a, b):
    return (a + b - 1) // b


def _tensorcores_per_chip():
    """2 on v7x (dual TensorCore per chip), 1 on v5e/v6e. Defaults to 1 if unknown."""
    try:
        kind = jax.devices()[0].device_kind.lower()
    except Exception:
        return 1
    return 2 if "v7" in kind else 1


def _matmul_bn_relu_kernel(x_ref, w_ref, shift_ref, o_ref):
    """One M-tile of the fused conv-as-matmul + folded-BatchNorm + ReLU.

    x_ref:     (TILE_M, K)      bf16 im2col patches (K = KH*KW*Cin, left unpadded)
    w_ref:     (K, Cout_p)      bf16 conv weights with the BN scale pre-folded, Cout padded to 128
    shift_ref: (1, Cout_p)      f32  beta + scale * (conv_bias - running_mean)   (lane-dense)
    o_ref:     (TILE_M, Cout_p) bf16 output tile                                  (lane-dense)
    """
    acc = jnp.dot(x_ref[...], w_ref[...], preferred_element_type=jnp.float32)
    y = acc + shift_ref[...]                                  # f32 epilogue (v5e has no bf16 VPU)
    o_ref[...] = jnp.maximum(y, 0.0).astype(o_ref.dtype)      # cast to bf16 only on the store


@functools.partial(jax.jit,
                   static_argnames=("eps", "compute_dtype", "num_m_tiles", "training"))
def conv_block_forward(x_nchw, w_oihw, conv_bias, gamma, beta,
                       running_mean, running_var, eps=1e-5,
                       compute_dtype=jnp.bfloat16, num_m_tiles=None,
                       training=False):
    """Pallas implementation of ConvBlock.forward (eval mode), NCHW in / NCHW out."""
    if training:
        # TODO(synk): batch-stat BatchNorm + stochastic Dropout2d not implemented.
        raise NotImplementedError("conv_block_forward implements eval-mode semantics only")

    N, Cin, H, W = x_nchw.shape
    Cout, _, KH, KW = w_oihw.shape
    pad = 1  # kernel_size=3, stride=1, padding=1, dilation=1

    M = N * H * W
    K = KH * KW * Cin
    Cp = _round_up(Cout, _LANE)

    # Generation-aware M tiling: one tile per TensorCore (capped for VMEM safety).
    if num_m_tiles is None:
        num_m_tiles = _tensorcores_per_chip()
    tiles = max(num_m_tiles, _cdiv(M, _MAX_TILE_M))
    tile_m = _round_up(_cdiv(M, tiles), 16)   # 16: bf16 sublane packing of the output block
    Mp = tile_m * tiles

    # ---- XLA-side glue (fuses with the boundary transpose): layout + im2col ----
    x_nhwc = jnp.transpose(x_nchw, (0, 2, 3, 1)).astype(compute_dtype)  # cast before im2col
    x_pad = jnp.pad(x_nhwc, ((0, 0), (pad, pad), (pad, pad), (0, 0)))
    # im2col: (N, H, W, KH*KW*Cin), tap-major (kh, kw, cin) to match the weight reshape below.
    taps = [x_pad[:, kh:kh + H, kw:kw + W, :]
            for kh in range(KH) for kw in range(KW)]
    x_mat = jnp.concatenate(taps, axis=-1).reshape(M, K)
    if Mp > M:
        x_mat = jnp.pad(x_mat, ((0, Mp - M), (0, 0)))

    # Fold BatchNorm (running stats) + conv bias:
    #   y = scale * (conv(x, w) + b - mean) + beta = conv(x, w * scale) + shift
    scale = (gamma / jnp.sqrt(running_var + eps)).astype(jnp.float32)
    shift = (beta + scale * (conv_bias - running_mean)).astype(jnp.float32)

    w_mat = jnp.transpose(w_oihw, (2, 3, 1, 0)).reshape(K, Cout).astype(jnp.float32)
    w_mat = (w_mat * scale[None, :]).astype(compute_dtype)      # fold BN scale into weights
    w_mat = jnp.pad(w_mat, ((0, 0), (0, Cp - Cout)))
    shift_p = jnp.pad(shift, (0, Cp - Cout)).reshape(1, Cp)

    out = pl.pallas_call(
        _matmul_bn_relu_kernel,
        out_shape=jax.ShapeDtypeStruct((Mp, Cp), jnp.bfloat16),
        grid=(tiles,),
        in_specs=[
            pl.BlockSpec((tile_m, K), lambda i: (i, 0)),   # im2col tile (K left unpadded)
            pl.BlockSpec((K, Cp), lambda i: (0, 0)),       # scaled weights (resident)
            pl.BlockSpec((1, Cp), lambda i: (0, 0)),       # shift (lane-dense)
        ],
        out_specs=pl.BlockSpec((tile_m, Cp), lambda i: (i, 0)),
        compiler_params=pltpu.CompilerParams(
            dimension_semantics=("parallel",),
            vmem_limit_bytes=32 * 1024 * 1024,   # well under v7x's 64 MiB physical VMEM
        ),
    )(x_mat, w_mat, shift_p)

    out = out[:M, :Cout].reshape(N, H, W, Cout).astype(x_nchw.dtype)
    return jnp.transpose(out, (0, 3, 1, 2))  # back to NCHW


def _reference(x_nchw, w_oihw, conv_bias, gamma, beta,
               running_mean, running_var, eps=1e-5, quantize=False):
    """Pure-JAX (XLA) reference of the eval-mode forward.

    quantize=True folds the BN scale into the weights and applies the same bf16
    rounding (matmul operands + output store) as the Pallas kernel, for a tight check.
    """
    scale = gamma / jnp.sqrt(running_var + eps)
    shift = beta + scale * (conv_bias - running_mean)
    w_eff = w_oihw * scale[:, None, None, None]
    if quantize:
        x_nchw = x_nchw.astype(jnp.bfloat16).astype(jnp.float32)
        w_eff = w_eff.astype(jnp.bfloat16).astype(jnp.float32)
    y = lax.conv_general_dilated(
        x_nchw, w_eff, window_strides=(1, 1), padding=((1, 1), (1, 1)),
        dimension_numbers=("NCHW", "OIHW", "NCHW"),
        precision=lax.Precision.HIGHEST)
    y = y + shift[None, :, None, None]
    y = jnp.maximum(y, 0.0)
    if quantize:
        y = y.astype(jnp.bfloat16).astype(jnp.float32)
    return y


if __name__ == "__main__":
    key = jax.random.PRNGKey(0)
    N, Cin, Cout, H, W = 2, 4, 8, 16, 16
    KH = KW = 3

    k = jax.random.split(key, 7)
    x = jax.random.normal(k[0], (N, Cin, H, W), dtype=jnp.float32)
    conv_w = jax.random.normal(k[1], (Cout, Cin, KH, KW), dtype=jnp.float32) * 0.1
    conv_b = jax.random.normal(k[2], (Cout,), dtype=jnp.float32) * 0.1
    gamma = 1.0 + 0.1 * jax.random.normal(k[3], (Cout,), dtype=jnp.float32)
    beta = 0.1 * jax.random.normal(k[4], (Cout,), dtype=jnp.float32)
    running_mean = 0.1 * jax.random.normal(k[5], (Cout,), dtype=jnp.float32)
    running_var = jnp.abs(jax.random.normal(k[6], (Cout,), dtype=jnp.float32)) + 0.5

    out = conv_block_forward(x, conv_w, conv_b, gamma, beta,
                             running_mean, running_var)
    out = jax.block_until_ready(out)
    assert out.shape == (N, Cout, H, W)

    # (1) Tight check vs. a reference that applies the same bf16 rounding
    #     (folded-scale weights, bf16 operands, bf16 output store) as the kernel.
    ref_q = _reference(x, conv_w, conv_b, gamma, beta, running_mean, running_var,
                       quantize=True)
    assert jnp.allclose(out, ref_q, atol=2e-2, rtol=2e-2), "mismatch vs folded bf16 reference"

    # (2) Sanity check vs. exact f32 module semantics (looser: bf16 MXU operands/store).
    ref = _reference(x, conv_w, conv_b, gamma, beta, running_mean, running_var,
                     quantize=False)
    assert jnp.allclose(out, ref, atol=6e-2, rtol=6e-2), "mismatch vs f32 reference"

    print("KERNEL_OK")
</pallas_src>

<mosaic_0001>
module attributes {stable_mosaic.version = 11 : i64} {
  func.func @_matmul_bn_relu_kernel(%arg0: i32, %arg1: memref<512x36xbf16, #tpu.memory_space<vmem>>, %arg2: memref<36x128xbf16, #tpu.memory_space<vmem>>, %arg3: memref<1x128xf32, #tpu.memory_space<vmem>>, %arg4: memref<512x128xbf16, #tpu.memory_space<vmem>>) attributes {dimension_semantics = [#tpu.dimension_semantics<parallel>], iteration_bounds = array<i64: 1>, scalar_prefetch = 0 : i64, scratch_operands = 0 : i64, tpu.core_type = #tpu.core_type<tc>, window_params = [{transform_indices = @transform_0, window_bounds = array<i64: 512, 36>}, {pipeline_mode = #tpu.pipeline_mode<synchronous>, transform_indices = @transform_1, window_bounds = array<i64: 36, 128>}, {pipeline_mode = #tpu.pipeline_mode<synchronous>, transform_indices = @transform_2, window_bounds = array<i64: 1, 128>}, {transform_indices = @transform_3, window_bounds = array<i64: 512, 128>}]} {
    %c0 = arith.constant 0 : index
    %c0_0 = arith.constant 0 : index
    %0 = vector.load %arg1[%c0, %c0_0] : memref<512x36xbf16, #tpu.memory_space<vmem>>, vector<512x36xbf16>
    %c0_1 = arith.constant 0 : index
    %c0_2 = arith.constant 0 : index
    %1 = vector.load %arg2[%c0_1, %c0_2] : memref<36x128xbf16, #tpu.memory_space<vmem>>, vector<36x128xbf16>
    %cst = arith.constant dense<0.000000e+00> : vector<512x128xf32>
    %2 = tpu.matmul %0, %1, %cst {dimension_numbers = #tpu.dot_dimension_numbers<[1], [0], [0], [1], [0, 0, 1, 1], [], []>} : vector<512x36xbf16>, vector<36x128xbf16>, vector<512x128xf32> -> vector<512x128xf32>
    %c0_3 = arith.constant 0 : index
    %c0_4 = arith.constant 0 : index
    %3 = vector.load %arg3[%c0_3, %c0_4] : memref<1x128xf32, #tpu.memory_space<vmem>>, vector<1x128xf32>
    %4 = vector.broadcast %3 : vector<1x128xf32> to vector<512x128xf32>
    %5 = arith.addf %2, %4 : vector<512x128xf32>
    %cst_5 = arith.constant 0.000000e+00 : f32
    %6 = vector.broadcast %cst_5 : f32 to vector<512x128xf32>
    %7 = arith.maximumf %5, %6 : vector<512x128xf32>
    %8 = arith.truncf %7 : vector<512x128xf32> to vector<512x128xbf16>
    %c0_6 = arith.constant 0 : index
    %c0_7 = arith.constant 0 : index
    %9 = vector.load %arg4[%c0_6, %c0_7] : memref<512x128xbf16, #tpu.memory_space<vmem>>, vector<512x128xbf16>
    tpu.vector_store %arg4[%c0_6, %c0_7], %8 {strides = array<i32>} : memref<512x128xbf16, #tpu.memory_space<vmem>>, vector<512x128xbf16>,
    return
  }
  func.func @transform_0(%arg0: i32) -> (i32, i32) {
    %c0_i32 = arith.constant 0 : i32
    %c0_i32_0 = arith.constant 0 : i32
    return %arg0, %c0_i32 : i32, i32
  }
  func.func @transform_1(%arg0: i32) -> (i32, i32) {
    %c0_i32 = arith.constant 0 : i32
    %c0_i32_0 = arith.constant 0 : i32
    %c0_i32_1 = arith.constant 0 : i32
    return %c0_i32, %c0_i32_0 : i32, i32
  }
  func.func @transform_2(%arg0: i32) -> (i32, i32) {
    %c0_i32 = arith.constant 0 : i32
    %c0_i32_0 = arith.constant 0 : i32
    %c0_i32_1 = arith.constant 0 : i32
    return %c0_i32, %c0_i32_0 : i32, i32
  }
  func.func @transform_3(%arg0: i32) -> (i32, i32) {
    %c0_i32 = arith.constant 0 : i32
    %c0_i32_0 = arith.constant 0 : i32
    return %arg0, %c0_i32 : i32, i32
  }
}

</mosaic_0001>

<bundles_post_ra>
// kernel: conv_block_forward.1
= control target key start
LH: loop header
LB: loop body
LE: loop exit
PB: predicated region body
PF: predicated region fallthrough
CT: control target
= control target key end

     0   :  { %vm266_vm0 = vcmask 293888   ;;  %vm363_vm1 = vcmask 1041408   ;;  %s1901_s1 = inlined_call_operand.vmem [shape: bf16[36,128], index: 1, kind: input, shape index: {}]   ;;  %s1902_s0 = inlined_call_operand.vmem [shape: bf16[512,36], index: 0, kind: input, shape index: {}]   ;;  %s1903_s2 = inlined_call_operand.vmem [shape: f32[1,128], index: 2, kind: input, shape index: {}]   ;;  %s1904_s3 = inlined_call_operand.vmem [shape: bf16[512,128], index: 3, kind: output, shape index: {}]  }
   0x1   :  { %v1544_v0 = vld [vmem:[%s1901_s1] sm:$0xff]   ;;  %v1545_v1 = vld [vmem:[%s1901_s1 + $0x8] sm:$0xff]   ;;  %v1546_v2 = vld [vmem:[%s1901_s1 + $0x10] ss:$0 sps:$4 sm:$0x33]  }
   0x2   :  { %1466 = vmatprep.subr.bf16.mxu0 %v1544_v0  ;;  %1536 = vmatprep.subr.bf16.mxu1 %v1544_v0  ;;  %v1547_v3 = vld [vmem:[%s1902_s0] sm:$0xff]   ;;  %v365_v5 = vsel %vm363_vm1, %v1546_v2, 0  ;;  %v1549_v6 = vld [vmem:[%s1902_s0 + $0x8] sm:$0xff]   ;;  %v1551_v8 = vld [vmem:[%s1902_s0 + $0x10] sm:$0xff]  }
   0x3   :  { %1467 = vmatpush3.bf16.msra.mxu0 %v1544_v0  ;;  %1539 = vmatpush3.bf16.msra.mxu1 %v1544_v0  ;;  %v1548_v4 = vld [vmem:[%s1902_s0 + $0x80] sm:$0xff]   ;;  %v1550_v7 = vld [vmem:[%s1902_s0 + $0x88] sm:$0xff]   ;;  %v1552_v9 = vld [vmem:[%s1902_s0 + $0x90] sm:$0xff]  }
   0x4   :  { %1468 = vmatprep.subr.bf16.mxu0 %v1545_v1  ;;  %1537 = vmatprep.subr.bf16.mxu1 %v1545_v1  ;;  %v1553_v10 = vld [vmem:[%s1902_s0 + $0x18] sm:$0xff]   ;;  %v1555_v12 = vld [vmem:[%s1902_s0 + $0x20] sm:$0xff]   ;;  %v1557_v14 = vld [vmem:[%s1902_s0 + $0x28] sm:$0xff]  }
   0x5   :  { %1472 = vmatprep.mubr.msk.bf16.mxu0 %vm266_vm0, %v1547_v3  ;;  %1504 = vmatprep.mubr.msk.bf16.mxu1 %vm266_vm0, %v1548_v4  ;;  %v1554_v11 = vld [vmem:[%s1902_s0 + $0x98] sm:$0xff]   ;;  %v1556_v13 = vld [vmem:[%s1902_s0 + $0xa0] sm:$0xff]   ;;  %v1558_v15 = vld [vmem:[%s1902_s0 + $0xa8] sm:$0xff]  }
   0x6   :  { %v1559_v16 = vld [vmem:[%s1902_s0 + $0x30] sm:$0xff]   ;;  %v1561_v18 = vld [vmem:[%s1902_s0 + $0x38] sm:$0xff]   ;;  %v1563_v20 = vld [vmem:[%s1902_s0 + $0x40] sm:$0xff]  }
   0x7   :  { %1469 = vmatpush3.bf16.msra.mxu0 %v1545_v1  ;;  %1540 = vmatpush3.bf16.msra.mxu1 %v1545_v1  ;;  %v1560_v17 = vld [vmem:[%s1902_s0 + $0xb0] sm:$0xff]   ;;  %v1562_v19 = vld [vmem:[%s1902_s0 + $0xb8] sm:$0xff]   ;;  %v1564_v21 = vld [vmem:[%s1902_s0 + $0xc0] sm:$0xff]  }
   0x8   :  { %1542 = vmatprep.subr.msk.bf16.mxu0 %vm363_vm1, %v1546_v2  ;;  %1543 = vmatprep.subr.msk.bf16.mxu1 %vm363_vm1, %v1546_v2  ;;  %v1565_v22 = vld [vmem:[%s1902_s0 + $0x48] sm:$0xff]   ;;  %v1567_v24 = vld [vmem:[%s1902_s0 + $0x50] sm:$0xff]   ;;  %v1569_v26 = vld [vmem:[%s1902_s0 + $0x58] sm:$0xff]  }
   0x9   :  { %v1566_v23 = vld [vmem:[%s1902_s0 + $0xc8] sm:$0xff]   ;;  %v1568_v25 = vld [vmem:[%s1902_s0 + $0xd0] sm:$0xff]   ;;  %v1570_v27 = vld [vmem:[%s1902_s0 + $0xd8] sm:$0xff]  }
   0xa   :  { %v1571_v28 = vld [vmem:[%s1902_s0 + $0x60] sm:$0xff]   ;;  %v1573_v30 = vld [vmem:[%s1902_s0 + $0x68] sm:$0xff]   ;;  %v1575_v32 = vld [vmem:[%s1902_s0 + $0x70] sm:$0xff]  }
   0xb   :  { %1471 = vmatpush3.bf16.msra.mxu0 %v365_v5  ;;  %1541 = vmatpush3.bf16.msra.mxu1 %v365_v5  ;;  %v1572_v29 = vld [vmem:[%s1902_s0 + $0xe0] sm:$0xff]   ;;  %v1574_v31 = vld [vmem:[%s1902_s0 + $0xe8] sm:$0xff]   ;;  %v1576_v33 = vld [vmem:[%s1902_s0 + $0xf0] sm:$0xff]  }
   0xc   :  { %v1577_v34 = vld [vmem:[%s1902_s0 + $0x78] sm:$0xff]   ;;  %v1739_v36 = vld [vmem:[%s1903_s2] ss:$0 sm:$0xff] }
   0xd   :  { %v1578_v35 = vld [vmem:[%s1902_s0 + $0xf8] sm:$0xff]  }
   0xe   :  { %1473 = vmatmul.mubr.msk.bf16.vlgmr.msra.gmra.mrb[0].mxu0 %vm266_vm0, %v1549_v6  ;;  %1505 = vmatmul.mubr.msk.bf16.vlgmr.msra.gmra.mrb[0].mxu1 %vm266_vm0, %v1550_v7 }
   0xf   :  { %1476 = vmatprep.mubr.msk.bf16.mxu0 %vm266_vm0, %v1551_v8  ;;  %1508 = vmatprep.mubr.msk.bf16.mxu1 %vm266_vm0, %v1552_v9 }
  0x16   :  { %1477 = vmatmul.mubr.msk.bf16.gmra.mrb[4].mxu0 %vm266_vm0, %v1553_v10  ;;  %1509 = vmatmul.mubr.msk.bf16.gmra.mrb[4].mxu1 %vm266_vm0, %v1554_v11 }
  0x17   :  { %1480 = vmatprep.mubr.msk.bf16.mxu0 %vm266_vm0, %v1555_v12  ;;  %1512 = vmatprep.mubr.msk.bf16.mxu1 %vm266_vm0, %v1556_v13 }
  0x1e   :  { %1481 = vmatmul.mubr.msk.bf16.gmra.mrb[8].mxu0 %vm266_vm0, %v1557_v14  ;;  %1513 = vmatmul.mubr.msk.bf16.gmra.mrb[8].mxu1 %vm266_vm0, %v1558_v15 }
  0x1f   :  { %1484 = vmatprep.mubr.msk.bf16.mxu0 %vm266_vm0, %v1559_v16  ;;  %1516 = vmatprep.mubr.msk.bf16.mxu1 %vm266_vm0, %v1560_v17 }
  0x26   :  { %1485 = vmatmul.mubr.msk.bf16.gmra.mrb[12].mxu0 %vm266_vm0, %v1561_v18  ;;  %1517 = vmatmul.mubr.msk.bf16.gmra.mrb[12].mxu1 %vm266_vm0, %v1562_v19 }
  0x27   :  { %1488 = vmatprep.mubr.msk.bf16.mxu0 %vm266_vm0, %v1563_v20  ;;  %1520 = vmatprep.mubr.msk.bf16.mxu1 %vm266_vm0, %v1564_v21 }
  0x2e   :  { %1489 = vmatmul.mubr.msk.bf16.gmra.mrb[16].mxu0 %vm266_vm0, %v1565_v22  ;;  %1521 = vmatmul.mubr.msk.bf16.gmra.mrb[16].mxu1 %vm266_vm0, %v1566_v23 }
  0x2f   :  { %1492 = vmatprep.mubr.msk.bf16.mxu0 %vm266_vm0, %v1567_v24  ;;  %1524 = vmatprep.mubr.msk.bf16.mxu1 %vm266_vm0, %v1568_v25 }
  0x36   :  { %1493 = vmatmul.mubr.msk.bf16.gmra.mrb[20].mxu0 %vm266_vm0, %v1569_v26  ;;  %1525 = vmatmul.mubr.msk.bf16.gmra.mrb[20].mxu1 %vm266_vm0, %v1570_v27 }
  0x37   :  { %1496 = vmatprep.mubr.msk.bf16.mxu0 %vm266_vm0, %v1571_v28  ;;  %1528 = vmatprep.mubr.msk.bf16.mxu1 %vm266_vm0, %v1572_v29 }
  0x3e   :  { %1497 = vmatmul.mubr.msk.bf16.gmra.mrb[24].mxu0 %vm266_vm0, %v1573_v30  ;;  %1529 = vmatmul.mubr.msk.bf16.gmra.mrb[24].mxu1 %vm266_vm0, %v1574_v31 }
  0x3f   :  { %1500 = vmatprep.mubr.msk.bf16.mxu0 %vm266_vm0, %v1575_v32  ;;  %1532 = vmatprep.mubr.msk.bf16.mxu1 %vm266_vm0, %v1576_v33 }
  0x46   :  { %1501 = vmatmul.mubr.msk.bf16.gmra.mrb[28].mxu0 %vm266_vm0, %v1577_v34  ;;  %1533 = vmatmul.mubr.msk.bf16.gmra.mrb[28].mxu1 %vm266_vm0, %v1578_v35 }
  0xe1   :  { %v1474_v37 = vpop.f32.mrb[0].mxu0  ;;  %v1506_v38 = vpop.f32.mrb[0].mxu1 }
  0xe2   :  { %v410_v39 = vadd.f32 %v1474_v37, %v1739_v36  ;;  %v538_v40 = vadd.f32 %v1506_v38, %v1739_v36  ;;  %v401_v41 = vpop.f32.mrb[1].mxu0  ;;  %v529_v42 = vpop.f32.mrb[1].mxu1 }
  0xe3   :  { %v402_v43 = vadd.f32 %v1739_v36, %v401_v41  ;;  %v530_v44 = vadd.f32 %v1739_v36, %v529_v42  ;;  %v1475_v45 = vpop.f32.mrb[2].mxu0  ;;  %v1507_v46 = vpop.f32.mrb[2].mxu1 }
  0xe4   :  { %v413_v47 = vadd.f32 %v1475_v45, %v1739_v36  ;;  %v541_v48 = vadd.f32 %v1507_v46, %v1739_v36  ;;  %v404_v49 = vpop.f32.mrb[3].mxu0  ;;  %v532_v50 = vpop.f32.mrb[3].mxu1  ;;  %v658_v53 = vmax.f32 %v410_v39, 0.0  ;;  %v690_v54 = vmax.f32 %v538_v40, 0.0 }
  0xe5   :  { %v405_v51 = vadd.f32 %v1739_v36, %v404_v49  ;;  %v533_v52 = vadd.f32 %v1739_v36, %v532_v50  ;;  %v656_v57 = vmax.f32 %v402_v43, 0.0  ;;  %v688_v58 = vmax.f32 %v530_v44, 0.0 }
  0xe6   :  { %v659_v55 = vmax.f32 %v413_v47, 0.0  ;;  %v691_v56 = vmax.f32 %v541_v48, 0.0 }
  0xe7   :  { %v657_v59 = vmax.f32 %v405_v51, 0.0  ;;  %v689_v60 = vmax.f32 %v533_v52, 0.0 }
  0xe8   :  { %v1248_v61 = vpack.c.bf16 %v659_v55, %v658_v53  ;;  %v1328_v62 = vpack.c.bf16 %v691_v56, %v690_v54 }
  0xe9   :  { %v1243_v63 = vpack.c.bf16 %v657_v59, %v656_v57  ;;  %v1323_v0 = vpack.c.bf16 %v689_v60, %v688_v58  ;;  %v1478_v1 = vpop.f32.mrb[4].mxu0  ;;  %v1510_v2 = vpop.f32.mrb[4].mxu1 }
  0xea   :  { %1400 = vst [vmem:[%s1904_s3 + $0x8] sm:$0xff] %v1248_v61   ;;  %1416 = vst [vmem:[%s1904_s3 + $0x88] sm:$0xff] %v1328_v62   ;;  %v426_v3 = vadd.f32 %v1478_v1, %v1739_v36  ;;  %v554_v4 = vadd.f32 %v1510_v2, %v1739_v36  ;;  %v417_v5 = vpop.f32.mrb[5].mxu0  ;;  %v545_v6 = vpop.f32.mrb[5].mxu1 }
  0xeb   :  { %1244 = vst [vmem:[%s1904_s3] sm:$0xff] %v1243_v63   ;;  %1415 = vst [vmem:[%s1904_s3 + $0x80] sm:$0xff] %v1323_v0   ;;  %v418_v7 = vadd.f32 %v1739_v36, %v417_v5  ;;  %v546_v8 = vadd.f32 %v1739_v36, %v545_v6  ;;  %v1479_v9 = vpop.f32.mrb[6].mxu0  ;;  %v1511_v10 = vpop.f32.mrb[6].mxu1 }
  0xec   :  { %v429_v11 = vadd.f32 %v1479_v9, %v1739_v36  ;;  %v557_v12 = vadd.f32 %v1511_v10, %v1739_v36  ;;  %v420_v13 = vpop.f32.mrb[7].mxu0  ;;  %v548_v14 = vpop.f32.mrb[7].mxu1  ;;  %v662_v17 = vmax.f32 %v426_v3, 0.0  ;;  %v694_v18 = vmax.f32 %v554_v4, 0.0 }
  0xed   :  { %v421_v15 = vadd.f32 %v1739_v36, %v420_v13  ;;  %v549_v16 = vadd.f32 %v1739_v36, %v548_v14  ;;  %v660_v21 = vmax.f32 %v418_v7, 0.0  ;;  %v692_v22 = vmax.f32 %v546_v8, 0.0 }
  0xee   :  { %v663_v19 = vmax.f32 %v429_v11, 0.0  ;;  %v695_v20 = vmax.f32 %v557_v12, 0.0 }
  0xef   :  { %v661_v23 = vmax.f32 %v421_v15, 0.0  ;;  %v693_v24 = vmax.f32 %v549_v16, 0.0 }
  0xf0   :  { %v1258_v25 = vpack.c.bf16 %v663_v19, %v662_v17  ;;  %v1338_v26 = vpack.c.bf16 %v695_v20, %v694_v18 }
  0xf1   :  { %v1253_v27 = vpack.c.bf16 %v661_v23, %v660_v21  ;;  %v1333_v28 = vpack.c.bf16 %v693_v24, %v692_v22  ;;  %v1482_v29 = vpop.f32.mrb[8].mxu0  ;;  %v1514_v30 = vpop.f32.mrb[8].mxu1 }
  0xf2   :  { %1402 = vst [vmem:[%s1904_s3 + $0x18] sm:$0xff] %v1258_v25   ;;  %1418 = vst [vmem:[%s1904_s3 + $0x98] sm:$0xff] %v1338_v26   ;;  %v442_v31 = vadd.f32 %v1482_v29, %v1739_v36  ;;  %v570_v32 = vadd.f32 %v1514_v30, %v1739_v36  ;;  %v433_v33 = vpop.f32.mrb[9].mxu0  ;;  %v561_v34 = vpop.f32.mrb[9].mxu1 }
  0xf3   :  { %1401 = vst [vmem:[%s1904_s3 + $0x10] sm:$0xff] %v1253_v27   ;;  %1417 = vst [vmem:[%s1904_s3 + $0x90] sm:$0xff] %v1333_v28   ;;  %v434_v35 = vadd.f32 %v1739_v36, %v433_v33  ;;  %v562_v37 = vadd.f32 %v1739_v36, %v561_v34  ;;  %v1483_v38 = vpop.f32.mrb[10].mxu0  ;;  %v1515_v39 = vpop.f32.mrb[10].mxu1 }
  0xf4   :  { %v445_v40 = vadd.f32 %v1483_v38, %v1739_v36  ;;  %v573_v41 = vadd.f32 %v1515_v39, %v1739_v36  ;;  %v436_v42 = vpop.f32.mrb[11].mxu0  ;;  %v564_v43 = vpop.f32.mrb[11].mxu1  ;;  %v666_v46 = vmax.f32 %v442_v31, 0.0  ;;  %v698_v47 = vmax.f32 %v570_v32, 0.0 }
  0xf5   :  { %v437_v44 = vadd.f32 %v1739_v36, %v436_v42  ;;  %v565_v45 = vadd.f32 %v1739_v36, %v564_v43  ;;  %v664_v50 = vmax.f32 %v434_v35, 0.0  ;;  %v696_v51 = vmax.f32 %v562_v37, 0.0 }
  0xf6   :  { %v667_v48 = vmax.f32 %v445_v40, 0.0  ;;  %v699_v49 = vmax.f32 %v573_v41, 0.0 }
  0xf7   :  { %v665_v52 = vmax.f32 %v437_v44, 0.0  ;;  %v697_v53 = vmax.f32 %v565_v45, 0.0 }
  0xf8   :  { %v1268_v54 = vpack.c.bf16 %v667_v48, %v666_v46  ;;  %v1348_v55 = vpack.c.bf16 %v699_v49, %v698_v47 }
  0xf9   :  { %v1263_v56 = vpack.c.bf16 %v665_v52, %v664_v50  ;;  %v1343_v57 = vpack.c.bf16 %v697_v53, %v696_v51  ;;  %v1486_v58 = vpop.f32.mrb[12].mxu0  ;;  %v1518_v59 = vpop.f32.mrb[12].mxu1 }
  0xfa   :  { %1404 = vst [vmem:[%s1904_s3 + $0x28] sm:$0xff] %v1268_v54   ;;  %1420 = vst [vmem:[%s1904_s3 + $0xa8] sm:$0xff] %v1348_v55   ;;  %v458_v60 = vadd.f32 %v1486_v58, %v1739_v36  ;;  %v586_v61 = vadd.f32 %v1518_v59, %v1739_v36  ;;  %v449_v62 = vpop.f32.mrb[13].mxu0  ;;  %v577_v63 = vpop.f32.mrb[13].mxu1 }
  0xfb   :  { %1403 = vst [vmem:[%s1904_s3 + $0x20] sm:$0xff] %v1263_v56   ;;  %1419 = vst [vmem:[%s1904_s3 + $0xa0] sm:$0xff] %v1343_v57   ;;  %v450_v0 = vadd.f32 %v1739_v36, %v449_v62  ;;  %v578_v1 = vadd.f32 %v1739_v36, %v577_v63  ;;  %v1487_v2 = vpop.f32.mrb[14].mxu0  ;;  %v1519_v3 = vpop.f32.mrb[14].mxu1 }
  0xfc   :  { %v461_v4 = vadd.f32 %v1487_v2, %v1739_v36  ;;  %v589_v5 = vadd.f32 %v1519_v3, %v1739_v36  ;;  %v452_v6 = vpop.f32.mrb[15].mxu0  ;;  %v580_v7 = vpop.f32.mrb[15].mxu1  ;;  %v670_v10 = vmax.f32 %v458_v60, 0.0  ;;  %v702_v11 = vmax.f32 %v586_v61, 0.0 }
  0xfd   :  { %v453_v8 = vadd.f32 %v1739_v36, %v452_v6  ;;  %v581_v9 = vadd.f32 %v1739_v36, %v580_v7  ;;  %v668_v14 = vmax.f32 %v450_v0, 0.0  ;;  %v700_v15 = vmax.f32 %v578_v1, 0.0 }
  0xfe   :  { %v671_v12 = vmax.f32 %v461_v4, 0.0  ;;  %v703_v13 = vmax.f32 %v589_v5, 0.0 }
  0xff   :  { %v669_v16 = vmax.f32 %v453_v8, 0.0  ;;  %v701_v17 = vmax.f32 %v581_v9, 0.0 }
 0x100   :  { %v1278_v18 = vpack.c.bf16 %v671_v12, %v670_v10  ;;  %v1358_v19 = vpack.c.bf16 %v703_v13, %v702_v11 }
 0x101   :  { %v1273_v20 = vpack.c.bf16 %v669_v16, %v668_v14  ;;  %v1353_v21 = vpack.c.bf16 %v701_v17, %v700_v15  ;;  %v1490_v22 = vpop.f32.mrb[16].mxu0  ;;  %v1522_v23 = vpop.f32.mrb[16].mxu1 }
 0x102   :  { %1406 = vst [vmem:[%s1904_s3 + $0x38] sm:$0xff] %v1278_v18   ;;  %1422 = vst [vmem:[%s1904_s3 + $0xb8] sm:$0xff] %v1358_v19   ;;  %v474_v24 = vadd.f32 %v1490_v22, %v1739_v36  ;;  %v602_v25 = vadd.f32 %v1522_v23, %v1739_v36  ;;  %v465_v26 = vpop.f32.mrb[17].mxu0  ;;  %v593_v27 = vpop.f32.mrb[17].mxu1 }
 0x103   :  { %1405 = vst [vmem:[%s1904_s3 + $0x30] sm:$0xff] %v1273_v20   ;;  %1421 = vst [vmem:[%s1904_s3 + $0xb0] sm:$0xff] %v1353_v21   ;;  %v466_v28 = vadd.f32 %v1739_v36, %v465_v26  ;;  %v594_v29 = vadd.f32 %v1739_v36, %v593_v27  ;;  %v1491_v30 = vpop.f32.mrb[18].mxu0  ;;  %v1523_v31 = vpop.f32.mrb[18].mxu1 }
 0x104   :  { %v477_v32 = vadd.f32 %v1491_v30, %v1739_v36  ;;  %v605_v33 = vadd.f32 %v1523_v31, %v1739_v36  ;;  %v468_v34 = vpop.f32.mrb[19].mxu0  ;;  %v596_v35 = vpop.f32.mrb[19].mxu1  ;;  %v674_v39 = vmax.f32 %v474_v24, 0.0  ;;  %v706_v40 = vmax.f32 %v602_v25, 0.0 }
 0x105   :  { %v469_v37 = vadd.f32 %v1739_v36, %v468_v34  ;;  %v597_v38 = vadd.f32 %v1739_v36, %v596_v35  ;;  %v672_v43 = vmax.f32 %v466_v28, 0.0  ;;  %v704_v44 = vmax.f32 %v594_v29, 0.0 }
 0x106   :  { %v675_v41 = vmax.f32 %v477_v32, 0.0  ;;  %v707_v42 = vmax.f32 %v605_v33, 0.0 }
 0x107   :  { %v673_v45 = vmax.f32 %v469_v37, 0.0  ;;  %v705_v46 = vmax.f32 %v597_v38, 0.0 }
 0x108   :  { %v1288_v47 = vpack.c.bf16 %v675_v41, %v674_v39  ;;  %v1368_v48 = vpack.c.bf16 %v707_v42, %v706_v40 }
 0x109   :  { %v1283_v49 = vpack.c.bf16 %v673_v45, %v672_v43  ;;  %v1363_v50 = vpack.c.bf16 %v705_v46, %v704_v44  ;;  %v1494_v51 = vpop.f32.mrb[20].mxu0  ;;  %v1526_v52 = vpop.f32.mrb[20].mxu1 }
 0x10a   :  { %1408 = vst [vmem:[%s1904_s3 + $0x48] sm:$0xff] %v1288_v47   ;;  %1424 = vst [vmem:[%s1904_s3 + $0xc8] sm:$0xff] %v1368_v48   ;;  %v490_v53 = vadd.f32 %v1494_v51, %v1739_v36  ;;  %v618_v54 = vadd.f32 %v1526_v52, %v1739_v36  ;;  %v481_v55 = vpop.f32.mrb[21].mxu0  ;;  %v609_v56 = vpop.f32.mrb[21].mxu1 }
 0x10b   :  { %1407 = vst [vmem:[%s1904_s3 + $0x40] sm:$0xff] %v1283_v49   ;;  %1423 = vst [vmem:[%s1904_s3 + $0xc0] sm:$0xff] %v1363_v50   ;;  %v482_v57 = vadd.f32 %v1739_v36, %v481_v55  ;;  %v610_v58 = vadd.f32 %v1739_v36, %v609_v56  ;;  %v1495_v59 = vpop.f32.mrb[22].mxu0  ;;  %v1527_v60 = vpop.f32.mrb[22].mxu1 }
 0x10c   :  { %v493_v61 = vadd.f32 %v1495_v59, %v1739_v36  ;;  %v621_v62 = vadd.f32 %v1527_v60, %v1739_v36  ;;  %v484_v63 = vpop.f32.mrb[23].mxu0  ;;  %v612_v0 = vpop.f32.mrb[23].mxu1  ;;  %v678_v3 = vmax.f32 %v490_v53, 0.0  ;;  %v710_v4 = vmax.f32 %v618_v54, 0.0 }
 0x10d   :  { %v485_v1 = vadd.f32 %v1739_v36, %v484_v63  ;;  %v613_v2 = vadd.f32 %v1739_v36, %v612_v0  ;;  %v676_v7 = vmax.f32 %v482_v57, 0.0  ;;  %v708_v8 = vmax.f32 %v610_v58, 0.0 }
 0x10e   :  { %v679_v5 = vmax.f32 %v493_v61, 0.0  ;;  %v711_v6 = vmax.f32 %v621_v62, 0.0 }
 0x10f   :  { %v677_v9 = vmax.f32 %v485_v1, 0.0  ;;  %v709_v10 = vmax.f32 %v613_v2, 0.0 }
 0x110   :  { %v1298_v11 = vpack.c.bf16 %v679_v5, %v678_v3  ;;  %v1378_v12 = vpack.c.bf16 %v711_v6, %v710_v4 }
 0x111   :  { %v1293_v13 = vpack.c.bf16 %v677_v9, %v676_v7  ;;  %v1373_v14 = vpack.c.bf16 %v709_v10, %v708_v8  ;;  %v1498_v15 = vpop.f32.mrb[24].mxu0  ;;  %v1530_v16 = vpop.f32.mrb[24].mxu1 }
 0x112   :  { %1410 = vst [vmem:[%s1904_s3 + $0x58] sm:$0xff] %v1298_v11   ;;  %1426 = vst [vmem:[%s1904_s3 + $0xd8] sm:$0xff] %v1378_v12   ;;  %v506_v17 = vadd.f32 %v1498_v15, %v1739_v36  ;;  %v634_v18 = vadd.f32 %v1530_v16, %v1739_v36  ;;  %v497_v19 = vpop.f32.mrb[25].mxu0  ;;  %v625_v20 = vpop.f32.mrb[25].mxu1 }
 0x113   :  { %1409 = vst [vmem:[%s1904_s3 + $0x50] sm:$0xff] %v1293_v13   ;;  %1425 = vst [vmem:[%s1904_s3 + $0xd0] sm:$0xff] %v1373_v14   ;;  %v498_v21 = vadd.f32 %v1739_v36, %v497_v19  ;;  %v626_v22 = vadd.f32 %v1739_v36, %v625_v20  ;;  %v1499_v23 = vpop.f32.mrb[26].mxu0  ;;  %v1531_v24 = vpop.f32.mrb[26].mxu1 }
 0x114   :  { %v509_v25 = vadd.f32 %v1499_v23, %v1739_v36  ;;  %v637_v26 = vadd.f32 %v1531_v24, %v1739_v36  ;;  %v500_v27 = vpop.f32.mrb[27].mxu0  ;;  %v628_v28 = vpop.f32.mrb[27].mxu1  ;;  %v682_v31 = vmax.f32 %v506_v17, 0.0  ;;  %v714_v32 = vmax.f32 %v634_v18, 0.0 }
 0x115   :  { %v501_v29 = vadd.f32 %v1739_v36, %v500_v27  ;;  %v629_v30 = vadd.f32 %v1739_v36, %v628_v28  ;;  %v680_v35 = vmax.f32 %v498_v21, 0.0  ;;  %v712_v37 = vmax.f32 %v626_v22, 0.0 }
 0x116   :  { %v683_v33 = vmax.f32 %v509_v25, 0.0  ;;  %v715_v34 = vmax.f32 %v637_v26, 0.0 }
 0x117   :  { %v681_v38 = vmax.f32 %v501_v29, 0.0  ;;  %v713_v39 = vmax.f32 %v629_v30, 0.0 }
 0x118   :  { %v1308_v40 = vpack.c.bf16 %v683_v33, %v682_v31  ;;  %v1388_v41 = vpack.c.bf16 %v715_v34, %v714_v32 }
 0x119   :  { %v1303_v42 = vpack.c.bf16 %v681_v38, %v680_v35  ;;  %v1383_v43 = vpack.c.bf16 %v713_v39, %v712_v37  ;;  %v1502_v44 = vpop.f32.mrb[28].mxu0  ;;  %v1534_v45 = vpop.f32.mrb[28].mxu1 }
 0x11a   :  { %1412 = vst [vmem:[%s1904_s3 + $0x68] sm:$0xff] %v1308_v40   ;;  %1428 = vst [vmem:[%s1904_s3 + $0xe8] sm:$0xff] %v1388_v41   ;;  %v522_v46 = vadd.f32 %v1502_v44, %v1739_v36  ;;  %v650_v47 = vadd.f32 %v1534_v45, %v1739_v36  ;;  %v513_v48 = vpop.f32.mrb[29].mxu0  ;;  %v641_v49 = vpop.f32.mrb[29].mxu1 }
 0x11b   :  { %1411 = vst [vmem:[%s1904_s3 + $0x60] sm:$0xff] %v1303_v42   ;;  %1427 = vst [vmem:[%s1904_s3 + $0xe0] sm:$0xff] %v1383_v43   ;;  %v514_v50 = vadd.f32 %v1739_v36, %v513_v48  ;;  %v642_v51 = vadd.f32 %v1739_v36, %v641_v49  ;;  %v1503_v52 = vpop.f32.mrb[30].mxu0  ;;  %v1535_v53 = vpop.f32.mrb[30].mxu1 }
 0x11c   :  { %v525_v54 = vadd.f32 %v1503_v52, %v1739_v36  ;;  %v653_v55 = vadd.f32 %v1535_v53, %v1739_v36  ;;  %v516_v56 = vpop.f32.mrb[31].mxu0  ;;  %v644_v57 = vpop.f32.mrb[31].mxu1  ;;  %v686_v60 = vmax.f32 %v522_v46, 0.0  ;;  %v718_v61 = vmax.f32 %v650_v47, 0.0 }
 0x11d   :  { %v517_v58 = vadd.f32 %v1739_v36, %v516_v56  ;;  %v645_v59 = vadd.f32 %v1739_v36, %v644_v57  ;;  %v684_v0 = vmax.f32 %v514_v50, 0.0  ;;  %v716_v1 = vmax.f32 %v642_v51, 0.0 }
 0x11e   :  { %v687_v62 = vmax.f32 %v525_v54, 0.0  ;;  %v719_v63 = vmax.f32 %v653_v55, 0.0 }
 0x11f   :  { %v685_v2 = vmax.f32 %v517_v58, 0.0  ;;  %v717_v3 = vmax.f32 %v645_v59, 0.0 }
 0x120   :  { %v1318_v4 = vpack.c.bf16 %v687_v62, %v686_v60  ;;  %v1398_v5 = vpack.c.bf16 %v719_v63, %v718_v61 }
 0x121   :  { %v1313_v6 = vpack.c.bf16 %v685_v2, %v684_v0  ;;  %v1393_v7 = vpack.c.bf16 %v717_v3, %v716_v1 }
 0x122   :  { %1414 = vst [vmem:[%s1904_s3 + $0x78] sm:$0xff] %v1318_v4   ;;  %1430 = vst [vmem:[%s1904_s3 + $0xf8] sm:$0xff] %v1398_v5  }
 0x123   :  { %1413 = vst [vmem:[%s1904_s3 + $0x70] sm:$0xff] %v1313_v6   ;;  %1429 = vst [vmem:[%s1904_s3 + $0xf0] sm:$0xff] %v1393_v7  }

</bundles_post_ra>
